<compile_context>
chip_gen: v7x
topology: tpu7x:2x2x1
jax: 0.10.0
libtpu: 0.0.40
codegen_flags: <defaults>
</compile_context>

<pallas_src>
import functools

import jax
import jax.numpy as jnp
from jax.experimental import pallas as pl
from jax.experimental.pallas import tpu as pltpu


_TILE_B_CAP = 2048  # rows per grid step (multiple of 16)


def _cdiv(a, b):
    return -(-a // b)


def _round_up(a, m):
    return _cdiv(a, m) * m


def _make_kernel(num_hidden_layers, compute_dtype):
    """Fused forward kernel.

    Ref order:
      x_ref    (TILE_B, W*I)                 inputs, window-major on the lane axis
      w1_ref   (W*I, W*H)                    block-diag first SubNet linear
      wh_ref   (num_hidden_layers, W*H, W*H) block-diag hidden SubNet linears
      b_ref    (num_hidden_layers+1, 1, W*H) tiled SubNet biases (first, then hidden)
      wc_ref   (W*H, H)                      original combine weight (un-split)
      co_ref   (2, 1, H)                     row 0 = combine bias, row 1 = output weight
      bo_ref   (1, 1)  SMEM                  output bias scalar
      out_ref  (TILE_B, 1)
    """
    cd = jnp.dtype(compute_dtype)

    def kernel(x_ref, w1_ref, wh_ref, b_ref, wc_ref, co_ref, bo_ref, out_ref):
        # --- SubNet, all window positions fused via block-diagonal weights ---
        h = jnp.dot(x_ref[...], w1_ref[...], preferred_element_type=jnp.float32)
        h = jnp.maximum(h + b_ref[0], 0.0)                       # (TILE_B, W*H) f32
        for li in range(num_hidden_layers):
            h = jnp.dot(h.astype(cd), wh_ref[li],
                        preferred_element_type=jnp.float32)
            h = h + b_ref[li + 1]
            if li < num_hidden_layers - 1:                       # last SubNet linear: no ReLU
                h = jnp.maximum(h, 0.0)

        # --- combine_layer: packed activation is window-major, matching Wc rows ---
        h = jnp.dot(h.astype(cd), wc_ref[...],
                    preferred_element_type=jnp.float32)
        h = jnp.maximum(h + co_ref[0], 0.0)                      # (TILE_B, H) f32

        # --- output_layer (H -> 1): VPU multiply + lane reduction, no MXU pass ---
        logits = jnp.sum(h * co_ref[1], axis=-1, keepdims=True) + bo_ref[0, 0]
        # (TILE_B, 1) masked store; lane-dense XLU-transposed output is a further
        # (small) option at out-width 1 — intentionally not taken.
        out_ref[...] = jax.nn.sigmoid(logits)

    return kernel


def init_params(key, input_dim, window_size, num_layers, hidden_dim):
    """Parameter init mirroring the PyTorch module's shapes.

    Returns a dict:
      "sub":     [(W (in,out), b (1,out))] for the num_layers+1 SubNet linears
      "combine": (Wc (window*hidden, hidden), bc (1, hidden))
      "output":  (Wo (1, hidden) row, bo (1, 1))
    Weights that feed matmuls are stored as (in, out) so y = x @ W + b matches
    PyTorch's x @ W.T + b.
    """

    def linear(k, fan_in, fan_out):
        kw, kb = jax.random.split(k)
        bound = 1.0 / jnp.sqrt(fan_in)
        w = jax.random.uniform(kw, (fan_in, fan_out), jnp.float32, -bound, bound)
        b = jax.random.uniform(kb, (1, fan_out), jnp.float32, -bound, bound)
        return w, b

    sub = []
    dims = [(input_dim, hidden_dim)] + [(hidden_dim, hidden_dim)] * num_layers
    for fan_in, fan_out in dims:
        key, k = jax.random.split(key)
        sub.append(linear(k, fan_in, fan_out))

    key, k = jax.random.split(key)
    combine = linear(k, window_size * hidden_dim, hidden_dim)

    key, k = jax.random.split(key)
    wo_t, bo = linear(k, hidden_dim, 1)        # wo_t: (hidden, 1)
    output = (wo_t.T, bo.reshape(1, 1))        # (1, hidden) row + (1,1) scalar

    return {"sub": sub, "combine": combine, "output": output}


@functools.partial(
    jax.jit,
    static_argnames=("window_size", "hidden_dim", "num_layers", "tile_b",
                     "compute_dtype"),
)
def binary_classifier_forward(x, params, *, window_size, hidden_dim, num_layers,
                              tile_b=None, compute_dtype="float32"):
    assert num_layers >= 1
    batch = x.shape[0]
    input_dim = x.shape[-1]
    win_in = window_size * input_dim
    win_hid = window_size * hidden_dim
    cd = jnp.dtype(compute_dtype)

    # --- x: contiguous (batch, window*input_dim) slab, no transpose/relayout ---
    x_flat = x.reshape(batch, win_in).astype(cd)

    # --- batch tiling: >=2 grid steps when batch is nontrivial (v7x 2-TC) ---
    if tile_b is None:
        tile_b = max(16, min(_TILE_B_CAP, _round_up(_cdiv(batch, 2), 16)))
    else:
        tile_b = _round_up(int(tile_b), 8)
    batch_p = _round_up(batch, tile_b)
    if batch_p != batch:
        x_flat = jnp.pad(x_flat, ((0, batch_p - batch), (0, 0)))
    grid = (batch_p // tile_b,)

    # --- block-diagonal SubNet weights (window folded into the lane axis) ---
    sub = params["sub"]
    (w1, b1) = sub[0]
    eye = jnp.eye(window_size, dtype=jnp.float32)
    w1_bd = jnp.kron(eye, w1).astype(cd)                      # (W*I, W*H)
    wh_stack = jnp.stack(
        [jnp.kron(eye, w) for (w, _) in sub[1:]], axis=0).astype(cd)  # (L, W*H, W*H)
    b_stack = jnp.stack(
        [jnp.tile(b1, (1, window_size))]
        + [jnp.tile(b, (1, window_size)) for (_, b) in sub[1:]],
        axis=0).astype(jnp.float32)                           # (L+1, 1, W*H)

    wc, bc = params["combine"]                                # (W*H, H), (1, H)
    wc = wc.astype(cd)
    wo, bo = params["output"]                                 # (1, H), (1, 1)
    co_pack = jnp.stack([bc, wo], axis=0).astype(jnp.float32)  # (2, 1, H)
    bo = bo.astype(jnp.float32)                               # (1, 1) -> SMEM

    in_specs = [
        pl.BlockSpec((tile_b, win_in), lambda i: (i, 0)),                 # x
        pl.BlockSpec((win_in, win_hid), lambda i: (0, 0)),                # w1_bd
        pl.BlockSpec((num_layers, win_hid, win_hid), lambda i: (0, 0, 0)),  # wh_stack
        pl.BlockSpec((num_layers + 1, 1, win_hid), lambda i: (0, 0, 0)),  # b_stack
        pl.BlockSpec((win_hid, hidden_dim), lambda i: (0, 0)),            # wc
        pl.BlockSpec((2, 1, hidden_dim), lambda i: (0, 0, 0)),            # co_pack
        pl.BlockSpec(memory_space=pltpu.MemorySpace.SMEM),                # bo scalar
    ]
    out_specs = pl.BlockSpec((tile_b, 1), lambda i: (i, 0))

    # Advisory cost estimate for XLA scheduling.
    flops = batch_p * (
        2 * win_in * win_hid                      # first SubNet linear (block-diag)
        + num_layers * 2 * win_hid * win_hid      # hidden SubNet linears
        + 2 * win_hid * hidden_dim                # combine layer
        + 2 * hidden_dim                          # output reduction
    )
    wbytes = (int(w1_bd.size) + int(wh_stack.size) + int(wc.size)) * cd.itemsize \
        + (int(b_stack.size) + int(co_pack.size) + 1) * 4
    bytes_accessed = int(x_flat.size) * cd.itemsize + wbytes + batch_p * 4
    cost = pl.CostEstimate(flops=int(flops), transcendentals=int(batch_p),
                           bytes_accessed=int(bytes_accessed))

    kernel = _make_kernel(num_layers, compute_dtype)

    out = pl.pallas_call(
        kernel,
        out_shape=jax.ShapeDtypeStruct((batch_p, 1), jnp.float32),
        grid=grid,
        in_specs=in_specs,
        out_specs=out_specs,
        compiler_params=pltpu.CompilerParams(dimension_semantics=("parallel",)),
        cost_estimate=cost,
    )(x_flat, w1_bd, wh_stack, b_stack, wc, co_pack, bo)

    return out[:batch]


def reference_forward(x, params):
    """Pure-JAX reference matching the PyTorch forward."""
    batch = x.shape[0]
    h = x.reshape(-1, x.shape[-1]).astype(jnp.float32)
    n_sub = len(params["sub"])
    for li, (w, b) in enumerate(params["sub"]):
        h = h @ w + b
        if li < n_sub - 1:
            h = jnp.maximum(h, 0.0)
    h = h.reshape(batch, -1)
    wc, bc = params["combine"]
    h = jnp.maximum(h @ wc + bc, 0.0)
    wo, bo = params["output"]  # wo: (1, hidden), bo: (1, 1)
    return jax.nn.sigmoid(h @ wo.T + bo)


if __name__ == "__main__":
    window_size = 4
    input_dim = 16
    hidden_dim = 32
    num_layers = 2

    key = jax.random.PRNGKey(0)
    kx, kx2, kp = jax.random.split(key, 3)
    params = init_params(kp, input_dim, window_size, num_layers, hidden_dim)

    # 1) Small demo batch (single tile), f32.  Block-diag packing only adds
    #    exact-zero MACs, so it matches the reference to f32 matmul precision.
    batch = 2
    x = jax.random.normal(kx, (batch, window_size, input_dim), dtype=jnp.float32)
    out = binary_classifier_forward(
        x, params,
        window_size=window_size, hidden_dim=hidden_dim, num_layers=num_layers,
    )
    out = jax.block_until_ready(out)
    ref = reference_forward(x, params)
    assert out.shape == (batch, 1)
    assert jnp.allclose(out, ref, atol=1e-5, rtol=1e-5)

    # 2) Multi-tile / padded path (batch=20, tile_b=8 -> 3 grid steps), f32.
    batch2 = 20
    x2 = jax.random.normal(kx2, (batch2, window_size, input_dim), dtype=jnp.float32)
    out2 = binary_classifier_forward(
        x2, params,
        window_size=window_size, hidden_dim=hidden_dim, num_layers=num_layers,
        tile_b=8,
    )
    out2 = jax.block_until_ready(out2)
    ref2 = reference_forward(x2, params)
    assert out2.shape == (batch2, 1)
    assert jnp.allclose(out2, ref2, atol=1e-5, rtol=1e-5)

    # 3) bf16 MXU inputs (x + matmul weights), f32 accumulation / elementwise.
    #    MXU-native dtype on v5e/v6e/v7x; tolerance accordingly looser.
    out3 = binary_classifier_forward(
        x2, params,
        window_size=window_size, hidden_dim=hidden_dim, num_layers=num_layers,
        compute_dtype="bfloat16",
    )
    out3 = jax.block_until_ready(out3)
    assert out3.shape == (batch2, 1)
    assert jnp.allclose(out3, ref2, atol=5e-2, rtol=0.0)

    print("KERNEL_OK")
</pallas_src>

<mosaic_0001>
module attributes {stable_mosaic.version = 11 : i64} {
  func.func @kernel(%arg0: i32, %arg1: memref<16x64xf32, #tpu.memory_space<vmem>>, %arg2: memref<64x128xf32, #tpu.memory_space<vmem>>, %arg3: memref<2x128x128xf32, #tpu.memory_space<vmem>>, %arg4: memref<3x1x128xf32, #tpu.memory_space<vmem>>, %arg5: memref<128x32xf32, #tpu.memory_space<vmem>>, %arg6: memref<2x1x32xf32, #tpu.memory_space<vmem>>, %arg7: memref<1x1xf32, #tpu.memory_space<smem>>, %arg8: memref<16x1xf32, #tpu.memory_space<vmem>>) attributes {dimension_semantics = [#tpu.dimension_semantics<parallel>], iteration_bounds = array<i64: 1>, scalar_prefetch = 0 : i64, scratch_operands = 0 : i64, tpu.core_type = #tpu.core_type<tc>, window_params = [{transform_indices = @transform_0, window_bounds = array<i64: 16, 64>}, {pipeline_mode = #tpu.pipeline_mode<synchronous>, transform_indices = @transform_1, window_bounds = array<i64: 64, 128>}, {pipeline_mode = #tpu.pipeline_mode<synchronous>, transform_indices = @transform_2, window_bounds = array<i64: 2, 128, 128>}, {pipeline_mode = #tpu.pipeline_mode<synchronous>, transform_indices = @transform_3, window_bounds = array<i64: 3, 1, 128>}, {pipeline_mode = #tpu.pipeline_mode<synchronous>, transform_indices = @transform_4, window_bounds = array<i64: 128, 32>}, {pipeline_mode = #tpu.pipeline_mode<synchronous>, transform_indices = @transform_5, window_bounds = array<i64: 2, 1, 32>}, {transform_indices = @transform_6, window_bounds = array<i64: 1, 1>}, {transform_indices = @transform_7, window_bounds = array<i64: 16, 1>}]} {
    %c0 = arith.constant 0 : index
    %c0_0 = arith.constant 0 : index
    %0 = vector.load %arg1[%c0, %c0_0] : memref<16x64xf32, #tpu.memory_space<vmem>>, vector<16x64xf32>
    %c0_1 = arith.constant 0 : index
    %c0_2 = arith.constant 0 : index
    %1 = vector.load %arg2[%c0_1, %c0_2] : memref<64x128xf32, #tpu.memory_space<vmem>>, vector<64x128xf32>
    %cst = arith.constant dense<0.000000e+00> : vector<16x128xf32>
    %2 = tpu.matmul %0, %1, %cst {dimension_numbers = #tpu.dot_dimension_numbers<[1], [0], [0], [1], [0, 0, 1, 1], [], []>} : vector<16x64xf32>, vector<64x128xf32>, vector<16x128xf32> -> vector<16x128xf32>
    %c0_3 = arith.constant 0 : index
    %c0_4 = arith.constant 0 : index
    %c0_5 = arith.constant 0 : index
    %3 = vector.load %arg4[%c0_3, %c0_4, %c0_5] : memref<3x1x128xf32, #tpu.memory_space<vmem>>, vector<1x1x128xf32>
    %4 = vector.shape_cast %3 : vector<1x1x128xf32> to vector<1x128xf32>
    %5 = vector.broadcast %4 : vector<1x128xf32> to vector<16x128xf32>
    %6 = arith.addf %2, %5 : vector<16x128xf32>
    %cst_6 = arith.constant 0.000000e+00 : f32
    %7 = vector.broadcast %cst_6 : f32 to vector<16x128xf32>
    %8 = arith.maximumf %6, %7 : vector<16x128xf32>
    %c0_7 = arith.constant 0 : index
    %c0_8 = arith.constant 0 : index
    %c0_9 = arith.constant 0 : index
    %9 = vector.load %arg3[%c0_7, %c0_8, %c0_9] : memref<2x128x128xf32, #tpu.memory_space<vmem>>, vector<1x128x128xf32>
    %10 = vector.shape_cast %9 : vector<1x128x128xf32> to vector<128x128xf32>
    %cst_10 = arith.constant dense<0.000000e+00> : vector<16x128xf32>
    %11 = tpu.matmul %8, %10, %cst_10 {dimension_numbers = #tpu.dot_dimension_numbers<[1], [0], [0], [1], [0, 0, 1, 1], [], []>} : vector<16x128xf32>, vector<128x128xf32>, vector<16x128xf32> -> vector<16x128xf32>
    %c1 = arith.constant 1 : index
    %c0_11 = arith.constant 0 : index
    %c0_12 = arith.constant 0 : index
    %12 = vector.load %arg4[%c1, %c0_11, %c0_12] : memref<3x1x128xf32, #tpu.memory_space<vmem>>, vector<1x1x128xf32>
    %13 = vector.shape_cast %12 : vector<1x1x128xf32> to vector<1x128xf32>
    %14 = vector.broadcast %13 : vector<1x128xf32> to vector<16x128xf32>
    %15 = arith.addf %11, %14 : vector<16x128xf32>
    %cst_13 = arith.constant 0.000000e+00 : f32
    %16 = vector.broadcast %cst_13 : f32 to vector<16x128xf32>
    %17 = arith.maximumf %15, %16 : vector<16x128xf32>
    %c1_14 = arith.constant 1 : index
    %c0_15 = arith.constant 0 : index
    %c0_16 = arith.constant 0 : index
    %18 = vector.load %arg3[%c1_14, %c0_15, %c0_16] : memref<2x128x128xf32, #tpu.memory_space<vmem>>, vector<1x128x128xf32>
    %19 = vector.shape_cast %18 : vector<1x128x128xf32> to vector<128x128xf32>
    %cst_17 = arith.constant dense<0.000000e+00> : vector<16x128xf32>
    %20 = tpu.matmul %17, %19, %cst_17 {dimension_numbers = #tpu.dot_dimension_numbers<[1], [0], [0], [1], [0, 0, 1, 1], [], []>} : vector<16x128xf32>, vector<128x128xf32>, vector<16x128xf32> -> vector<16x128xf32>
    %c2 = arith.constant 2 : index
    %c0_18 = arith.constant 0 : index
    %c0_19 = arith.constant 0 : index
    %21 = vector.load %arg4[%c2, %c0_18, %c0_19] : memref<3x1x128xf32, #tpu.memory_space<vmem>>, vector<1x1x128xf32>
    %22 = vector.shape_cast %21 : vector<1x1x128xf32> to vector<1x128xf32>
    %23 = vector.broadcast %22 : vector<1x128xf32> to vector<16x128xf32>
    %24 = arith.addf %20, %23 : vector<16x128xf32>
    %c0_20 = arith.constant 0 : index
    %c0_21 = arith.constant 0 : index
    %25 = vector.load %arg5[%c0_20, %c0_21] : memref<128x32xf32, #tpu.memory_space<vmem>>, vector<128x32xf32>
    %cst_22 = arith.constant dense<0.000000e+00> : vector<16x32xf32>
    %26 = tpu.matmul %24, %25, %cst_22 {dimension_numbers = #tpu.dot_dimension_numbers<[1], [0], [0], [1], [0, 0, 1, 1], [], []>} : vector<16x128xf32>, vector<128x32xf32>, vector<16x32xf32> -> vector<16x32xf32>
    %c0_23 = arith.constant 0 : index
    %c0_24 = arith.constant 0 : index
    %c0_25 = arith.constant 0 : index
    %27 = vector.load %arg6[%c0_23, %c0_24, %c0_25] : memref<2x1x32xf32, #tpu.memory_space<vmem>>, vector<1x1x32xf32>
    %28 = vector.shape_cast %27 : vector<1x1x32xf32> to vector<1x32xf32>
    %29 = vector.broadcast %28 : vector<1x32xf32> to vector<16x32xf32>
    %30 = arith.addf %26, %29 : vector<16x32xf32>
    %cst_26 = arith.constant 0.000000e+00 : f32
    %31 = vector.broadcast %cst_26 : f32 to vector<16x32xf32>
    %32 = arith.maximumf %30, %31 : vector<16x32xf32>
    %c1_27 = arith.constant 1 : index
    %c0_28 = arith.constant 0 : index
    %c0_29 = arith.constant 0 : index
    %33 = vector.load %arg6[%c1_27, %c0_28, %c0_29] : memref<2x1x32xf32, #tpu.memory_space<vmem>>, vector<1x1x32xf32>
    %34 = vector.shape_cast %33 : vector<1x1x32xf32> to vector<1x32xf32>
    %35 = vector.broadcast %34 : vector<1x32xf32> to vector<16x32xf32>
    %36 = arith.mulf %32, %35 : vector<16x32xf32>
    %cst_30 = arith.constant dense<0.000000e+00> : vector<16xf32>
    %37 = vector.multi_reduction <add>, %36, %cst_30 [1] : vector<16x32xf32> to vector<16xf32>
    %38 = vector.shape_cast %37 : vector<16xf32> to vector<16x1xf32>
    %c0_31 = arith.constant 0 : index
    %c0_32 = arith.constant 0 : index
    %39 = memref.load %arg7[%c0_31, %c0_32] : memref<1x1xf32, #tpu.memory_space<smem>>
    %40 = vector.broadcast %39 : f32 to vector<16x1xf32>
    %41 = arith.addf %38, %40 : vector<16x1xf32>
    %42 = arith.negf %41 : vector<16x1xf32>
    %43 = math.exp %42 : vector<16x1xf32>
    %cst_33 = arith.constant 1.000000e+00 : f32
    %44 = vector.broadcast %cst_33 : f32 to vector<16x1xf32>
    %45 = arith.addf %44, %43 : vector<16x1xf32>
    %46 = arith.divf %44, %45 : vector<16x1xf32>
    %c0_34 = arith.constant 0 : index
    %c0_35 = arith.constant 0 : index
    %47 = vector.load %arg8[%c0_34, %c0_35] : memref<16x1xf32, #tpu.memory_space<vmem>>, vector<16x1xf32>
    tpu.vector_store %arg8[%c0_34, %c0_35], %46 {strides = array<i32>} : memref<16x1xf32, #tpu.memory_space<vmem>>, vector<16x1xf32>,
    return
  }
  func.func @transform_0(%arg0: i32) -> (i32, i32) {
    %c0_i32 = arith.constant 0 : i32
    %c0_i32_0 = arith.constant 0 : i32
    return %arg0, %c0_i32 : i32, i32
  }
  func.func @transform_1(%arg0: i32) -> (i32, i32) {
    %c0_i32 = arith.constant 0 : i32
    %c0_i32_0 = arith.constant 0 : i32
    %c0_i32_1 = arith.constant 0 : i32
    return %c0_i32, %c0_i32_0 : i32, i32
  }
  func.func @transform_2(%arg0: i32) -> (i32, i32, i32) {
    %c0_i32 = arith.constant 0 : i32
    %c0_i32_0 = arith.constant 0 : i32
    %c0_i32_1 = arith.constant 0 : i32
    %c0_i32_2 = arith.constant 0 : i32
    return %c0_i32, %c0_i32_0, %c0_i32_1 : i32, i32, i32
  }
  func.func @transform_3(%arg0: i32) -> (i32, i32, i32) {
    %c0_i32 = arith.constant 0 : i32
    %c0_i32_0 = arith.constant 0 : i32
    %c0_i32_1 = arith.constant 0 : i32
    %c0_i32_2 = arith.constant 0 : i32
    return %c0_i32, %c0_i32_0, %c0_i32_1 : i32, i32, i32
  }
  func.func @transform_4(%arg0: i32) -> (i32, i32) {
    %c0_i32 = arith.constant 0 : i32
    %c0_i32_0 = arith.constant 0 : i32
    %c0_i32_1 = arith.constant 0 : i32
    return %c0_i32, %c0_i32_0 : i32, i32
  }
  func.func @transform_5(%arg0: i32) -> (i32, i32, i32) {
    %c0_i32 = arith.constant 0 : i32
    %c0_i32_0 = arith.constant 0 : i32
    %c0_i32_1 = arith.constant 0 : i32
    %c0_i32_2 = arith.constant 0 : i32
    return %c0_i32, %c0_i32_0, %c0_i32_1 : i32, i32, i32
  }
  func.func @transform_6(%arg0: i32) -> (i32, i32) {
    %c0_i32 = arith.constant 0 : i32
    %c0_i32_0 = arith.constant 0 : i32
    %c0_i32_1 = arith.constant 0 : i32
    return %c0_i32, %c0_i32_0 : i32, i32
  }
  func.func @transform_7(%arg0: i32) -> (i32, i32) {
    %c0_i32 = arith.constant 0 : i32
    %c0_i32_0 = arith.constant 0 : i32
    return %arg0, %c0_i32 : i32, i32
  }
}

</mosaic_0001>

<bundles_post_ra>
// kernel: binary_classifier_forward.1
= control target key start
LH: loop header
LB: loop body
LE: loop exit
PB: predicated region body
PF: predicated region fallthrough
CT: control target
= control target key end

     0   :  { %vm44_vm0 = vcmask 523264   ;;  %vm439_vm1 = vcmask 261120   ;;  %vm462_vm2 = vcmask 7168   ;;  %s1045_s1 = inlined_call_operand.vmem [shape: f32[64,128], index: 1, kind: input, shape index: {}]   ;;  %s1046_s0 = inlined_call_operand.vmem [shape: f32[16,64], index: 0, kind: input, shape index: {}]   ;;  %s1047_s2 = inlined_call_operand.vmem [shape: f32[2,128,128], index: 2, kind: input, shape index: {}]   ;;  %s1048_s3 = inlined_call_operand.vmem [shape: f32[3,1,128], index: 3, kind: input, shape index: {}]   ;;  %s1049_s4 = inlined_call_operand.vmem [shape: f32[128,32], index: 4, kind: input, shape index: {}]   ;;  %s1050_s5 = inlined_call_operand.vmem [shape: f32[2,1,32], index: 5, kind: input, shape index: {}]   ;;  %s1051_s6 = inlined_call_operand.<no memory space> [shape: f32[1,1], index: 6, kind: input, shape index: {}]   ;;  %s1052_s7 = inlined_call_operand.vmem [shape: f32[16,1], index: 7, kind: output, shape index: {}]  }
   0x1   :  { %v29_v0 = vld [vmem:[%s1045_s1] sm:$0xff]  ;;  %v30_v1 = vld [vmem:[%s1045_s1 + $0x8] sm:$0xff]  ;;  %v31_v2 = vld [vmem:[%s1045_s1 + $0x10] sm:$0xff] }
   0x2   :  { %v685_v3 = vpack.c.bf16 %v30_v1, %v29_v0  ;;  %v32_v4 = vld [vmem:[%s1045_s1 + $0x18] sm:$0xff]  ;;  %v33_v6 = vld [vmem:[%s1045_s1 + $0x20] sm:$0xff]  ;;  %v34_v7 = vld [vmem:[%s1045_s1 + $0x28] sm:$0xff] }
   0x3   :  { %v689_v5 = vpack.c.bf16 %v32_v4, %v31_v2  ;;  %v27_v8 = vld [vmem:[%s1046_s0] sm:$0xff]  ;;  %v129_v10 = vld [vmem:[%s1047_s2 + $0x8] sm:$0xff]  ;;  %v130_v12 = vld [vmem:[%s1047_s2 + $0x10] sm:$0xff]  ;;  %v693_v14 = vpack.c.bf16 %v34_v7, %v33_v6 }
   0x4   :  { %686 = vmatprep.subr.bf16.mxu0 %v685_v3  ;;  %577 = vmatprep.mubr.msk.f32.mxu0 %vm44_vm0, %v27_v8  ;;  %v128_v9 = vld [vmem:[%s1047_s2] sm:$0xff]  ;;  %v131_v13 = vld [vmem:[%s1047_s2 + $0x18] sm:$0xff]  ;;  %v133_v17 = vld [vmem:[%s1047_s2 + $0x28] sm:$0xff] }
   0x5   :  { %688 = vmatpush3.bf16.msra.mxu0 %v685_v3  ;;  %v701_v11 = vpack.c.bf16 %v129_v10, %v128_v9  ;;  %v705_v15 = vpack.c.bf16 %v131_v13, %v130_v12  ;;  %v132_v16 = vld [vmem:[%s1047_s2 + $0x20] sm:$0xff]  ;;  %v35_v18 = vld [vmem:[%s1045_s1 + $0x30] sm:$0xff]  ;;  %v36_v19 = vld [vmem:[%s1045_s1 + $0x38] sm:$0xff] }
   0x6   :  { %690 = vmatprep.subr.bf16.mxu0 %v689_v5  ;;  %v709_v20 = vpack.c.bf16 %v133_v17, %v132_v16  ;;  %v697_v21 = vpack.c.bf16 %v36_v19, %v35_v18  ;;  %v134_v22 = vld [vmem:[%s1047_s2 + $0x30] sm:$0xff]  ;;  %v135_v23 = vld [vmem:[%s1047_s2 + $0x38] sm:$0xff]  ;;  %v136_v25 = vld [vmem:[%s1047_s2 + $0x40] sm:$0xff] }
   0x7   :  { %702 = vmatprep.subr.bf16.mxu1 %v701_v11  ;;  %v713_v24 = vpack.c.bf16 %v135_v23, %v134_v22  ;;  %v137_v26 = vld [vmem:[%s1047_s2 + $0x48] sm:$0xff]  ;;  %v138_v29 = vld [vmem:[%s1047_s2 + $0x50] sm:$0xff]  ;;  %v139_v30 = vld [vmem:[%s1047_s2 + $0x58] sm:$0xff] }
   0x8   :  { %704 = vmatpush3.bf16.msra.mxu1 %v701_v11  ;;  %v28_v27 = vld [vmem:[%s1046_s0 + $0x8] sm:$0xff]  ;;  %v717_v28 = vpack.c.bf16 %v137_v26, %v136_v25  ;;  %v721_v31 = vpack.c.bf16 %v139_v30, %v138_v29  ;;  %v140_v32 = vld [vmem:[%s1047_s2 + $0x60] sm:$0xff]  ;;  %v142_v35 = vld [vmem:[%s1047_s2 + $0x70] sm:$0xff] }
   0x9   :  { %692 = vmatpush3.bf16.msra.mxu0 %v689_v5  ;;  %706 = vmatprep.subr.bf16.mxu1 %v705_v15  ;;  %v141_v33 = vld [vmem:[%s1047_s2 + $0x68] sm:$0xff]  ;;  %v143_v36 = vld [vmem:[%s1047_s2 + $0x78] sm:$0xff]  ;;  %v474_v38 = vld [vmem:[%s1047_s2 + $0x80] sm:$0xff] }
   0xa   :  { %694 = vmatprep.subr.bf16.mxu0 %v693_v14  ;;  %v725_v34 = vpack.c.bf16 %v141_v33, %v140_v32  ;;  %v729_v37 = vpack.c.bf16 %v143_v36, %v142_v35  ;;  %v475_v39 = vld [vmem:[%s1047_s2 + $0x88] sm:$0xff]  ;;  %v476_v40 = vld [vmem:[%s1047_s2 + $0x90] sm:$0xff]  ;;  %v477_v42 = vld [vmem:[%s1047_s2 + $0x98] sm:$0xff] }
   0xb   :  { %v733_v41 = vpack.c.bf16 %v475_v39, %v474_v38  ;;  %v737_v43 = vpack.c.bf16 %v477_v42, %v476_v40  ;;  %v478_v44 = vld [vmem:[%s1047_s2 + $0xa0] sm:$0xff]  ;;  %v479_v45 = vld [vmem:[%s1047_s2 + $0xa8] sm:$0xff]  ;;  %v480_v47 = vld [vmem:[%s1047_s2 + $0xb0] sm:$0xff] }
   0xc   :  { %708 = vmatpush3.bf16.msra.mxu1 %v705_v15  ;;  %v741_v46 = vpack.c.bf16 %v479_v45, %v478_v44  ;;  %v481_v48 = vld [vmem:[%s1047_s2 + $0xb8] sm:$0xff]  ;;  %v482_v50 = vld [vmem:[%s1047_s2 + $0xc0] sm:$0xff]  ;;  %v483_v51 = vld [vmem:[%s1047_s2 + $0xc8] sm:$0xff] }
   0xd   :  { %696 = vmatpush3.bf16.msra.mxu0 %v693_v14  ;;  %710 = vmatprep.subr.bf16.mxu1 %v709_v20  ;;  %v745_v49 = vpack.c.bf16 %v481_v48, %v480_v47  ;;  %v749_v52 = vpack.c.bf16 %v483_v51, %v482_v50  ;;  %v484_v53 = vld [vmem:[%s1047_s2 + $0xd0] sm:$0xff]  ;;  %v485_v54 = vld [vmem:[%s1047_s2 + $0xd8] sm:$0xff]  ;;  %v486_v56 = vld [vmem:[%s1047_s2 + $0xe0] sm:$0xff] }
   0xe   :  { %698 = vmatprep.subr.bf16.mxu0 %v697_v21  ;;  %v753_v55 = vpack.c.bf16 %v485_v54, %v484_v53  ;;  %v487_v57 = vld [vmem:[%s1047_s2 + $0xe8] sm:$0xff]  ;;  %v469_v59 = vld [vmem:[%s1048_s3] ss:$0 sm:$0xff]  ;;  %v488_v2 = vld [vmem:[%s1047_s2 + $0xf0] sm:$0xff]  ;;  %v447_v53 = vstv %s1051_s6 }
   0xf   :  { %v757_v58 = vpack.c.bf16 %v487_v57, %v486_v56  ;;  %v489_v3 = vld [vmem:[%s1047_s2 + $0xf8] sm:$0xff]  ;;  %v329_v5 = vld [vmem:[%s1049_s4] sm:$0xff]  ;;  %v330_v6 = vld [vmem:[%s1049_s4 + $0x8] sm:$0xff] }
  0x10   :  { %712 = vmatpush3.bf16.msra.mxu1 %v709_v20  ;;  %v761_v4 = vpack.c.bf16 %v489_v3, %v488_v2  ;;  %v331_v7 = vld [vmem:[%s1049_s4 + $0x10] sm:$0xff]  ;;  %v765_v8 = vpack.c.bf16 %v330_v6, %v329_v5  ;;  %v332_v9 = vld [vmem:[%s1049_s4 + $0x18] sm:$0xff]  ;;  %v333_v11 = vld [vmem:[%s1049_s4 + $0x20] sm:$0xff] }
  0x11   :  { %700 = vmatpush3.bf16.msra.mxu0 %v697_v21  ;;  %714 = vmatprep.subr.bf16.mxu1 %v713_v24  ;;  %v769_v10 = vpack.c.bf16 %v332_v9, %v331_v7  ;;  %v334_v12 = vld [vmem:[%s1049_s4 + $0x28] sm:$0xff]  ;;  %v335_v14 = vld [vmem:[%s1049_s4 + $0x30] sm:$0xff]  ;;  %v336_v15 = vld [vmem:[%s1049_s4 + $0x38] sm:$0xff] }
  0x12   :  { %734 = vmatprep.subr.bf16.mxu0 %v733_v41  ;;  %v773_v13 = vpack.c.bf16 %v334_v12, %v333_v11  ;;  %v777_v16 = vpack.c.bf16 %v336_v15, %v335_v14  ;;  %v337_v17 = vld [vmem:[%s1049_s4 + $0x40] sm:$0xff]  ;;  %v338_v18 = vld [vmem:[%s1049_s4 + $0x48] sm:$0xff]  ;;  %v339_v20 = vld [vmem:[%s1049_s4 + $0x50] sm:$0xff] }
  0x13   :  { %v781_v19 = vpack.c.bf16 %v338_v18, %v337_v17  ;;  %v340_v21 = vld [vmem:[%s1049_s4 + $0x58] sm:$0xff]  ;;  %v341_v23 = vld [vmem:[%s1049_s4 + $0x60] sm:$0xff]  ;;  %v343_v33 = vld [vmem:[%s1049_s4 + $0x70] sm:$0xff] }
  0x14   :  { %578 = vmatmul.mubr.msk.f32.vlgmr.msra.gmra.mrb[0].mxu0 %vm44_vm0, %v28_v27  ;;  %716 = vmatpush3.bf16.msra.mxu1 %v713_v24  ;;  %v785_v22 = vpack.c.bf16 %v340_v21, %v339_v20  ;;  %v342_v24 = vld [vmem:[%s1049_s4 + $0x68] sm:$0xff]  ;;  %v473_v26 = vld [vmem:[%s1048_s3 + $0x1] ss:$0 sm:$0xff]  ;;  %v491_v36 = vld [vmem:[%s1048_s3 + $0x2] ss:$0 sm:$0xff] }
  0x15   :  { %718 = vmatprep.subr.bf16.mxu1 %v717_v28  ;;  %736 = vmatpush3.bf16.msra.mxu0 %v733_v41  ;;  %v789_v25 = vpack.c.bf16 %v342_v24, %v341_v23  ;;  %v492_v41 = vld [vmem:[%s1050_s5] ss:$0 sm:$0xff] }
  0x16   :  { %738 = vmatprep.subr.bf16.mxu0 %v737_v43 }
  0x18   :  { %720 = vmatpush3.bf16.msra.mxu1 %v717_v28 }
  0x19   :  { %722 = vmatprep.subr.bf16.mxu1 %v721_v31  ;;  %740 = vmatpush3.bf16.msra.mxu0 %v737_v43 }
  0x1a   :  { %742 = vmatprep.subr.bf16.mxu0 %v741_v46 }
  0x1c   :  { %724 = vmatpush3.bf16.msra.mxu1 %v721_v31 }
  0x1d   :  { %726 = vmatprep.subr.bf16.mxu1 %v725_v34  ;;  %744 = vmatpush3.bf16.msra.mxu0 %v741_v46  ;;  %v494_v46 = vld [vmem:[%s1050_s5 + $0x1] ss:$0 sm:$0xff] }
  0x1e   :  { %746 = vmatprep.subr.bf16.mxu0 %v745_v49 }
  0x20   :  { %728 = vmatpush3.bf16.msra.mxu1 %v725_v34  ;;  %v344_v34 = vld [vmem:[%s1049_s4 + $0x78] sm:$0xff] }
  0x21   :  { %730 = vmatprep.subr.bf16.mxu1 %v729_v37  ;;  %748 = vmatpush3.bf16.msra.mxu0 %v745_v49  ;;  %v793_v35 = vpack.c.bf16 %v344_v34, %v343_v33 }
  0x22   :  { %750 = vmatprep.subr.bf16.mxu0 %v749_v52 }
  0x24   :  { %732 = vmatpush3.bf16.msra.mxu1 %v729_v37 }
  0x25   :  { %752 = vmatpush3.bf16.msra.mxu0 %v749_v52  ;;  %766 = vmatprep.subr.bf16.mxu1 %v765_v8 }
  0x26   :  { %754 = vmatprep.subr.bf16.mxu0 %v753_v55 }
  0x29   :  { %756 = vmatpush3.bf16.msra.mxu0 %v753_v55 }
  0x2a   :  { %758 = vmatprep.subr.bf16.mxu0 %v757_v58 }
  0x2d   :  { %760 = vmatpush3.bf16.msra.mxu0 %v757_v58 }
  0x2e   :  { %762 = vmatprep.subr.bf16.mxu0 %v761_v4 }
  0x31   :  { %764 = vmatpush3.bf16.msra.mxu0 %v761_v4 }
  0xe7   :  { %v579_v60 = vpop.f32.mrb[0].mxu0 }
  0xe8   :  { %v123_v61 = vadd.f32 %v579_v60, %v469_v59  ;;  %v117_v62 = vpop.f32.mrb[1].mxu0 }
  0xe9   :  { %v118_v63 = vadd.f32 %v469_v59, %v117_v62 }
  0xea   :  { %v127_v1 = vmax.f32 %v123_v61, 0.0 }
  0xeb   :  { %v126_v0 = vmax.f32 %v118_v63, 0.0 }
  0xed   :  { %612 = vmatprep.mubr.f32.mxu1 %v126_v0 }
  0xee   :  { %613 = vmatmul.mubr.f32.vlgmr.msra.gmra.mrb[0].mxu1 %v127_v1 }
  0xef   :  { %768 = vmatpush3.bf16.msra.mxu1 %v765_v8 }
  0xf0   :  { %770 = vmatprep.subr.bf16.mxu1 %v769_v10 }
  0xf3   :  { %772 = vmatpush3.bf16.msra.mxu1 %v769_v10 }
  0xf4   :  { %774 = vmatprep.subr.bf16.mxu1 %v773_v13 }
  0xf7   :  { %776 = vmatpush3.bf16.msra.mxu1 %v773_v13 }
  0xf8   :  { %778 = vmatprep.subr.bf16.mxu1 %v777_v16 }
  0xfb   :  { %780 = vmatpush3.bf16.msra.mxu1 %v777_v16 }
  0xfc   :  { %782 = vmatprep.subr.bf16.mxu1 %v781_v19 }
  0xff   :  { %784 = vmatpush3.bf16.msra.mxu1 %v781_v19 }
 0x100   :  { %786 = vmatprep.subr.bf16.mxu1 %v785_v22 }
 0x103   :  { %788 = vmatpush3.bf16.msra.mxu1 %v785_v22 }
 0x104   :  { %790 = vmatprep.subr.bf16.mxu1 %v789_v25 }
 0x107   :  { %792 = vmatpush3.bf16.msra.mxu1 %v789_v25 }
 0x108   :  { %794 = vmatprep.subr.bf16.mxu1 %v793_v35 }
 0x10b   :  { %796 = vmatpush3.bf16.msra.mxu1 %v793_v35 }
 0x1c1   :  { %v614_v27 = vpop.f32.mrb[0].mxu1 }
 0x1c2   :  { %v224_v28 = vadd.f32 %v614_v27, %v473_v26  ;;  %v218_v29 = vpop.f32.mrb[1].mxu1 }
 0x1c3   :  { %v219_v30 = vadd.f32 %v473_v26, %v218_v29 }
 0x1c4   :  { %v228_v32 = vmax.f32 %v224_v28, 0.0 }
 0x1c5   :  { %v227_v31 = vmax.f32 %v219_v30, 0.0 }
 0x1c7   :  { %647 = vmatprep.mubr.f32.mxu0 %v227_v31 }
 0x1c8   :  { %648 = vmatmul.mubr.f32.vlgmr.msra.gmra.mrb[2].mxu0 %v228_v32 }
 0x29b   :  { %v649_v37 = vpop.f32.mrb[2].mxu0 }
 0x29c   :  { %v320_v38 = vpop.f32.mrb[3].mxu0  ;;  %v326_v40 = vadd.f32 %v649_v37, %v491_v36 }
 0x29d   :  { %v321_v39 = vadd.f32 %v491_v36, %v320_v38 }
 0x29f   :  { %682 = vmatprep.mubr.f32.mxu1 %v321_v39 }
 0x2a0   :  { %683 = vmatmul.mubr.f32.vlgmr.msra.gmra.mrb[2].mxu1 %v326_v40 }
 0x373   :  { %v684_v42 = vpop.f32.mrb[2].mxu1 }
 0x374   :  { %v424_v43 = vadd.f32 %v684_v42, %v492_v41  ;;  %v418_v44 = vpop.f32.mrb[3].mxu1 }
 0x375   :  { %v419_v45 = vadd.f32 %v492_v41, %v418_v44 }
 0x376   :  { %v428_v47 = vmax.f32 %v424_v43, 0.0 }
 0x377   :  { %v427_v48 = vmax.f32 %v419_v45, 0.0 }
 0x378   :  { %v438_v51 = vmul.f32 %v494_v46, %v428_v47 }
 0x379   :  { %v437_v49 = vmul.f32 %v494_v46, %v427_v48 }
 0x37a   :  { %v443_v52 = vsel %vm439_vm1, %v438_v51, 0.0 }
 0x37b   :  { %v440_v50 = vsel %vm439_vm1, %v437_v49, 0.0 }
 0x37c   :  { %441 = vadd.xlane.f32.xlu0 %v440_v50 }
 0x380   :  { %444 = vadd.xlane.f32.xlu0 %v443_v52 }
 0x409   :  { %v442_v54 = vpop.xlane.xlu0 %441 }
 0x40a   :  { %v448_v55 = vadd.f32 %v447_v53, %v442_v54 }
 0x40c   :  { %v495_v56 = vmul.f32 -1.442695, %v448_v55 }
 0x40d   :  { %v445_v57 = vpop.xlane.xlu0 %444 }
 0x40e   :  { %797 = vpow2.f32 %v495_v56  ;;  %v449_v58 = vadd.f32 %v447_v53, %v445_v57 }
 0x410   :  { %v496_v59 = vmul.f32 -1.442695, %v449_v58 }
 0x412   :  { %799 = vpow2.f32 %v496_v59 }
 0x418   :  { %v798_v60 = vpop.eup %797 }
 0x419   :  { %v456_v61 = vadd.f32 1.0, %v798_v60 }
 0x41b   :  { %801 = vrcp.f32 %v456_v61 }
 0x41c   :  { %v800_v62 = vpop.eup %799 }
 0x41d   :  { %v457_v63 = vadd.f32 1.0, %v800_v62 }
 0x41f   :  { %803 = vrcp.f32 %v457_v63 }
 0x425   :  { %v802_v0 = vpop.eup %801 }
 0x426   :  { %463 = vst.msk [vmem:[%s1052_s7] sm:$0xff] %vm462_vm2, %v802_v0 }
 0x429   :  { %v804_v1 = vpop.eup %803 }
 0x42a   :  { %464 = vst.msk [vmem:[%s1052_s7 + $0x8] sm:$0xff] %vm462_vm2, %v804_v1 }

</bundles_post_ra>
